<compile_context>
chip_gen: v7x
topology: tpu7x:2x2x1
jax: 0.10.0
libtpu: 0.0.40
codegen_flags: <defaults>
</compile_context>

<pallas_src>
import math

import jax
import jax.numpy as jnp
from jax.experimental import pallas as pl
from jax.experimental.pallas import tpu as pltpu

_LANE = 128
_SUBLANE = 8
# ~2 MiB per output block (see header comment).
_TARGET_BLOCK_BYTES = 2 * 1024 * 1024


def _lcm(a: int, b: int) -> int:
    return a * b // math.gcd(a, b)


def _broadcast_kernel(w_ref, o_ref):
    # w_ref: (wr, nc) repeating weight block, VMEM-resident for the whole grid
    #        (constant index_map).  wr == 1 (plain row) or wr % 8 == 0.
    # o_ref: (tile_m, nc) output tile; tile_m % wr == 0 by construction.
    # No real compute: wall time is entirely the outgoing store DMA.
    wr, nc = w_ref.shape
    om = o_ref.shape[0]
    if wr == 1:
        # Pure sublane broadcast of a single row.
        o_ref[...] = jnp.broadcast_to(w_ref[...], o_ref.shape)
    elif om == wr:
        o_ref[...] = w_ref[...]
    else:
        reps = om // wr  # static
        # wr % 8 == 0 and nc % 128 == 0 -> sublane-aligned collapse, no relayout.
        o_ref[...] = jnp.broadcast_to(
            w_ref[...][None, :, :], (reps, wr, nc)
        ).reshape(om, nc)


def _tiled_row_broadcast(w_period: jax.Array, period_rows: int,
                         n_rows: int, n_cols: int) -> jax.Array:
    """Tile the (period_rows, n_cols) block vertically to (n_rows, n_cols).

    period_rows == 1, or n_rows % period_rows == 0 (guaranteed by caller).
    """
    dtype = w_period.dtype
    itemsize = jnp.dtype(dtype).itemsize
    bytes_per_row = n_cols * itemsize

    # Row-tile granularity: multiple of the repeating period and of 8 sublanes.
    unit = _lcm(period_rows, _SUBLANE)
    max_tile = max(unit,
                   (_TARGET_BLOCK_BYTES // max(1, bytes_per_row)) // unit * unit)

    if n_rows <= max_tile:
        # Single block equal to the full row extent (always a legal block shape,
        # no ragged tail for small sizes).
        tile_m = n_rows
        if period_rows == 1:
            w_block = w_period                                   # (1, n_cols)
        else:
            # Tiny pre-tile (<= one output block) so the kernel is a plain copy.
            w_block = jnp.tile(w_period, (n_rows // period_rows, 1))
    else:
        tile_m = max_tile
        if period_rows == 1:
            w_block = w_period                                   # (1, n_cols)
        else:
            # 8-aligned repeating unit; stays VMEM-resident across the grid.
            w_block = jnp.tile(w_period, (unit // period_rows, 1))

    grid_m = pl.cdiv(n_rows, tile_m)

    return pl.pallas_call(
        _broadcast_kernel,
        out_shape=jax.ShapeDtypeStruct((n_rows, n_cols), dtype),
        grid=(grid_m,),
        in_specs=[
            # Constant block index -> weight block DMA'd once, stays resident.
            pl.BlockSpec((w_block.shape[0], n_cols), lambda i: (0, 0)),
        ],
        out_specs=pl.BlockSpec((tile_m, n_cols), lambda i: (i, 0)),
        compiler_params=pltpu.CompilerParams(
            # Row axis is embarrassingly parallel -> shard across the two
            # TensorCores on v7x; harmless on single-TC v5e/v6e.
            dimension_semantics=("parallel",),
        ),
    )(w_block)


def episodic_embedding_forward(weights: jax.Array, size: int) -> jax.Array:
    """Equivalent of EpisodicEmbedding.forward(size).

    weights: (1, ndim) parameter row.
    returns: (size, ndim), every row equal to weights[0].
    """
    assert weights.ndim == 2 and weights.shape[0] == 1
    ndim = weights.shape[1]
    dtype = weights.dtype

    if size == 0:
        return jnp.zeros((0, ndim), dtype=dtype)

    itemsize = jnp.dtype(dtype).itemsize

    # Lane-dense path: ndim not a multiple of 128 but the flat output length
    # size*ndim is -> flat output is periodic with period lcm(ndim, 128), so we
    # can write a fully lane-dense (size*ndim/128, 128) slab (full unmasked
    # 128-lane stores) and reshape back.  Flat element order is identical, so
    # the result is bit-exact.
    use_packed = (ndim % _LANE != 0) and ((size * ndim) % _LANE == 0)
    if use_packed:
        g = math.gcd(ndim, _LANE)
        period_rows = ndim // g                      # rows of one 128-lane period
        unit = _lcm(period_rows, _SUBLANE)
        # Keep the resident repeating block comfortably small.
        if unit * _LANE * itemsize > _TARGET_BLOCK_BYTES // 4:
            use_packed = False

    if use_packed:
        n_rows = (size * ndim) // _LANE
        # One full period of the flat output: weights repeated lcm/ndim times.
        w_period = jnp.tile(weights, (1, _LANE // g)).reshape(period_rows, _LANE)
        out = _tiled_row_broadcast(w_period, period_rows, n_rows, _LANE)
        return out.reshape(size, ndim)

    # Direct path: ndim already a multiple of 128 (fully lane-dense as-is) or
    # shapes incompatible with repacking (e.g. size*ndim not a multiple of 128).
    return _tiled_row_broadcast(weights, 1, size, ndim)


def init_episodic_embedding_weights(key: jax.Array, ndim: int) -> jax.Array:
    """Deterministic kaiming_uniform_ (nonlinearity='relu') for shape (1, ndim).

    PyTorch kaiming_uniform_ on a (1, ndim) tensor: fan_in = ndim,
    gain = sqrt(2), bound = gain * sqrt(3 / fan_in).
    """
    fan_in = ndim
    gain = math.sqrt(2.0)
    bound = gain * math.sqrt(3.0 / fan_in)
    return jax.random.uniform(
        key, (1, ndim), dtype=jnp.float32, minval=-bound, maxval=bound
    )


if __name__ == "__main__":
    # Small shapes consistent with the module: ndim=32 hidden, size=8 rows.
    ndim = 32
    size = 8

    key = jax.random.PRNGKey(0)
    weights = init_episodic_embedding_weights(key, ndim)

    out = jax.block_until_ready(episodic_embedding_forward(weights, size))
    ref = jnp.broadcast_to(weights, (size, ndim))
    assert out.shape == (size, ndim), out.shape
    assert out.dtype == weights.dtype, out.dtype
    assert bool(jnp.array_equal(out, ref)), "mismatch (lane-dense, period=1 path)"

    # Direct path (ndim multiple of 128), single output block.
    w2 = init_episodic_embedding_weights(jax.random.PRNGKey(1), 256)
    out2 = jax.block_until_ready(episodic_embedding_forward(w2, 1000))
    assert out2.shape == (1000, 256)
    assert bool(jnp.array_equal(out2, jnp.broadcast_to(w2, (1000, 256)))), \
        "mismatch (direct single-block path)"

    # Lane-dense packed path with a multi-row period (lcm(96,128)=384 -> 3 rows),
    # multi-block grid with a ragged last block.
    w3 = init_episodic_embedding_weights(jax.random.PRNGKey(2), 96)
    out3 = jax.block_until_ready(episodic_embedding_forward(w3, 6144))
    assert out3.shape == (6144, 96)
    assert bool(jnp.array_equal(out3, jnp.broadcast_to(w3, (6144, 96)))), \
        "mismatch (lane-dense, multi-row period path)"

    # Direct path, multi-block grid with a ragged last block.
    w4 = init_episodic_embedding_weights(jax.random.PRNGKey(3), 128)
    out4 = jax.block_until_ready(episodic_embedding_forward(w4, 5000))
    assert out4.shape == (5000, 128)
    assert bool(jnp.array_equal(out4, jnp.broadcast_to(w4, (5000, 128)))), \
        "mismatch (direct multi-block path)"

    print("KERNEL_OK")
</pallas_src>

<mosaic_0001>
module attributes {stable_mosaic.version = 11 : i64} {
  func.func @_broadcast_kernel(%arg0: i32, %arg1: memref<1x128xf32, #tpu.memory_space<vmem>>, %arg2: memref<2x128xf32, #tpu.memory_space<vmem>>) attributes {dimension_semantics = [#tpu.dimension_semantics<parallel>], iteration_bounds = array<i64: 1>, scalar_prefetch = 0 : i64, scratch_operands = 0 : i64, tpu.core_type = #tpu.core_type<tc>, window_params = [{pipeline_mode = #tpu.pipeline_mode<synchronous>, transform_indices = @transform_0, window_bounds = array<i64: 1, 128>}, {transform_indices = @transform_1, window_bounds = array<i64: 2, 128>}]} {
    %c0 = arith.constant 0 : index
    %c0_0 = arith.constant 0 : index
    %0 = vector.load %arg1[%c0, %c0_0] : memref<1x128xf32, #tpu.memory_space<vmem>>, vector<1x128xf32>
    %1 = vector.shape_cast %0 : vector<1x128xf32> to vector<1x128xf32>
    %2 = vector.broadcast %1 : vector<1x128xf32> to vector<2x128xf32>
    %c0_1 = arith.constant 0 : index
    %c0_2 = arith.constant 0 : index
    %3 = vector.load %arg2[%c0_1, %c0_2] : memref<2x128xf32, #tpu.memory_space<vmem>>, vector<2x128xf32>
    tpu.vector_store %arg2[%c0_1, %c0_2], %2 {strides = array<i32>} : memref<2x128xf32, #tpu.memory_space<vmem>>, vector<2x128xf32>,
    return
  }
  func.func @transform_0(%arg0: i32) -> (i32, i32) {
    %c0_i32 = arith.constant 0 : i32
    %c0_i32_0 = arith.constant 0 : i32
    %c0_i32_1 = arith.constant 0 : i32
    return %c0_i32, %c0_i32_0 : i32, i32
  }
  func.func @transform_1(%arg0: i32) -> (i32, i32) {
    %c0_i32 = arith.constant 0 : i32
    %c0_i32_0 = arith.constant 0 : i32
    return %arg0, %c0_i32 : i32, i32
  }
}

</mosaic_0001>

<bundles_post_ra>
// kernel: tpu_custom_call.1
= control target key start
LH: loop header
LB: loop body
LE: loop exit
PB: predicated region body
PF: predicated region fallthrough
CT: control target
= control target key end

     0   :  { %6 = vsyncpa [#allocation3], 0  ;;  %s131_s0 = inlined_call_operand.hbm [shape: f32[1,128], index: 0, kind: input, shape index: {}]   ;;  %s132_s1 = inlined_call_operand.hbm [shape: f32[2,128], index: 1, kind: output, shape index: {}]  }
   0x1   :  { %7 = vsyncpa [#allocation4], 0  ;;  %s95_s6 = smov [#allocation2]   ;;  %s47_s10 = scalar_lea.hbm %s131_s0, 16 }
   0x2   :  { %s14_s7 = sshll.u32 %s95_s6, 4  ;;  %p48_p0 = scmp.ne.s32.totalorder %s131_s0, %s47_s10  ;;  %s15_s7 = int_to_ptr.vmem [resolvable:$true] %s14_s7 }
   0x3   :  { %p51_p1 = scmp.lt.u32.totalorder %s47_s10, %s131_s0 }
   0x5   :  { %p53_p2 = pnand %p51_p1, %p48_p0 }
   0x7   :  { %56 = shalt.err (!%p53_p2)
}
   0x8   :  { %s57_s15 = scalar_lea.vmem %s15_s7, 16  ;;  %s61_s16 = scalar_lea.vmem %s15_s7, 32 }
   0x9   :  { %p58_p3 = scmp.ne.s32.totalorder %s15_s7, %s57_s15  ;;  %p62_p4 = scmp.lt.s32.totalorder %s15_s7, %s15_s7 }
   0xa   :  { %p63_p5 = scmp.lt.s32.totalorder %s61_s16, %s57_s15 }
   0xc   :  { %p64_p6 = por %p63_p5, %p62_p4 }
   0xe   :  { %p65_p7 = pnand %p64_p6, %p58_p3 }
  0x10   :  { %68 = shalt.err (!%p65_p7)
}
  0x11   :  { %17 = dma.hbm_to_vmem [thread:$0]  %s131_s0, 16, %s15_s7, [#allocation3]  }
  0x12   :  { %91 = dma.done.wait [#allocation3], 16  }
  0x13   :  { %92 = vsyncadd [#allocation3], 4294967280  ;;  %s96_s19 = smov [#allocation5]   ;;  %v44_v0 = vld [vmem:[#allocation2] ss:$0 sm:$0xff] }
  0x14   :  { %s35_s20 = sshll.u32 %s96_s19, 4  ;;  %28 = vst [vmem:[#allocation5] sm:$0x3] %v44_v0  ;;  %s36_s20 = int_to_ptr.vmem [resolvable:$true] %s35_s20 }
  0x15   :  { %s69_s21 = scalar_lea.vmem %s36_s20, 32  ;;  %p74_p9 = scmp.lt.s32.totalorder %s36_s20, %s36_s20 }
  0x16   :  { %p70_p8 = scmp.ne.s32.totalorder %s36_s20, %s69_s21  ;;  %p75_p10 = scmp.lt.s32.totalorder %s69_s21, %s69_s21 }
  0x18   :  { %p76_p11 = por %p75_p10, %p74_p9 }
  0x1a   :  { %p77_p12 = pnand %p76_p11, %p70_p8 }
  0x1c   :  { %80 = shalt.err (!%p77_p12)
}
  0x1d   :  { %s81_s24 = scalar_lea.hbm %s132_s1, 32 }
  0x1e   :  { %p82_p13 = scmp.ne.s32.totalorder %s132_s1, %s81_s24  ;;  %p85_p0 = scmp.lt.u32.totalorder %s81_s24, %s132_s1 }
  0x20   :  { %p87_p1 = pnand %p85_p0, %p82_p13 }
  0x22   :  { %90 = shalt.err (!%p87_p1)
}
  0x23   :  { %38 = dma.vmem_to_hbm [thread:$0]  %s36_s20, 32, %s132_s1, [#allocation4]  }
  0x24   :  { %93 = dma.done.wait [#allocation4], 32  }
  0x25   :  { %94 = vsyncadd [#allocation4], 4294967264 }
  0x26   :  { %42 = vsyncpa [#allocation3], 1 }
  0x27   :  { %43 = vsyncpa [#allocation4], 1 }

</bundles_post_ra>
